<compile_context>
chip_gen: v7x
topology: tpu7x:2x2x1
jax: 0.10.0
libtpu: 0.0.40
codegen_flags: <defaults>
</compile_context>

<pallas_src>
import math

import jax
import jax.numpy as jnp
from jax.experimental import pallas as pl
from jax.experimental.pallas import tpu as pltpu


def _layerwise_attention_kernel(w1_ref, b1_ref, w2_ref, b2_ref, bsq_ref,   # SMEM (tiny)
                                u_ref, wsq_ref, wpt_ref, bp_ref,           # VMEM
                                out_ref):
    """Fused LayerwiseAttention forward for one tile of batch elements.

    u_ref   : (B_TILE, N_LAYERS, L, D)  stacked encoder outputs
    wsq_ref : (1, D)                    squeeze.weight (row)
    wpt_ref : (D, D_OUT)                output_projection.weight, pre-transposed on host
    bp_ref  : (1, D_OUT)
    w1/b1/w2/b2/bsq : gating MLP weights + squeeze bias (SMEM, scalar reads)
    out_ref : (B_TILE, L, D_OUT)
    """
    bt, num_layers, seq_len, d = u_ref.shape
    d_out = out_ref.shape[-1]
    n_half = w1_ref.shape[0]

    u = u_ref[...].astype(jnp.float32)                        # (BT, N, L, D)
    # Hoisted broadcasts (JAX does not CSE broadcast_in_dim inside loops).
    wsq = wsq_ref[...].astype(jnp.float32).reshape(1, 1, d)   # (1, 1, D)
    b_sq = bsq_ref[0]

    # ---- squeeze-linear folded into the sequence mean (one pass over U) -----
    z = []                                                    # N x (BT, 1, 1)
    for n in range(num_layers):
        ubar = jnp.mean(u[:, n], axis=1, keepdims=True)       # (BT, 1, D) sublane reduce
        z.append(jnp.sum(ubar * wsq, axis=-1, keepdims=True) + b_sq)

    # ---- tiny gating MLP across the layer axis ------------------------------
    # Layer axis lives in leading dims; mixing across layers uses SMEM scalar
    # weights, so there are no lane shuffles / relayouts / concatenates.
    hidden = []
    for j in range(n_half):
        acc = z[0] * w1_ref[j, 0] + b1_ref[j]
        for n in range(1, num_layers):
            acc = acc + w1_ref[j, n] * z[n]
        hidden.append(jnp.maximum(acc, 0.0))                  # ReLU, (BT, 1, 1)
    gates = []
    for n in range(num_layers):
        acc = hidden[0] * w2_ref[n, 0] + b2_ref[n]
        for j in range(1, n_half):
            acc = acc + w2_ref[n, j] * hidden[j]
        gates.append(jax.nn.sigmoid(acc))                     # (BT, 1, 1)

    # ---- layer-weighted sum (VPU, minor-dim broadcast only) -----------------
    u_sum = gates[0] * u[:, 0]
    for n in range(1, num_layers):
        u_sum = u_sum + gates[n] * u[:, n]                    # (BT, L, D)

    # ---- output projection: one big MXU matmul per grid step ----------------
    wpt = wpt_ref[...].astype(jnp.float32)                    # (D, D_out)
    bp = bp_ref[...].astype(jnp.float32)                      # (1, D_out)
    y = jnp.dot(u_sum.reshape(bt * seq_len, d), wpt,
                preferred_element_type=jnp.float32) + bp      # (BT*L, D_out)
    out_ref[...] = y.reshape(bt, seq_len, d_out).astype(out_ref.dtype)


def layerwise_attention(encoder_outputs, params, *, b_tile=None):
    """encoder_outputs: list of num_layers arrays, each (B, L, D). Returns (B, L, D_out)."""
    u = jnp.stack(encoder_outputs, axis=1)                    # (B, N, L, D)
    B, N, L, D = u.shape
    d_out = params["wp"].shape[0]

    if b_tile is None:   # largest divisor of B that is <= 8
        b_tile = max(t for t in range(1, min(B, 8) + 1) if B % t == 0)
    assert B % b_tile == 0, "b_tile must divide the batch size"
    grid = (B // b_tile,)

    smem = pl.BlockSpec(memory_space=pltpu.MemorySpace.SMEM)
    const2d = lambda r, c: pl.BlockSpec((r, c), lambda i: (0, 0))

    args = (
        params["w1"], params["b1"], params["w2"], params["b2"],
        params["b_sq"].reshape(1),
        u,
        params["w_sq"].reshape(1, D),
        params["wp"].T,                                       # transpose once on the host
        params["bp"].reshape(1, d_out),
    )

    return pl.pallas_call(
        _layerwise_attention_kernel,
        out_shape=jax.ShapeDtypeStruct((B, L, d_out), u.dtype),
        grid_spec=pltpu.PrefetchScalarGridSpec(
            num_scalar_prefetch=0,
            grid=grid,
            in_specs=[
                smem, smem, smem, smem, smem,                       # w1 b1 w2 b2 b_sq
                pl.BlockSpec((b_tile, N, L, D), lambda i: (i, 0, 0, 0)),  # U
                const2d(1, D),                                      # squeeze weight
                const2d(D, d_out),                                  # Wp^T
                const2d(1, d_out),                                  # bp
            ],
            out_specs=pl.BlockSpec((b_tile, L, d_out), lambda i: (i, 0, 0)),
        ),
        compiler_params=pltpu.CompilerParams(
            dimension_semantics=("parallel",),
            vmem_limit_bytes=64 * 1024 * 1024,   # safe on v5e/v6e/v7x; headroom for bigger U tiles
        ),
    )(*args)


def reference_forward(encoder_outputs, params):
    """Pure-JAX reference mirroring the PyTorch module."""
    u = jnp.stack(encoder_outputs, axis=1)                       # (B, N, L, D)
    z = jnp.einsum("bnld,d->bnl", u, params["w_sq"].reshape(-1)) + params["b_sq"].reshape(())[None]
    z = z.mean(axis=2)                                           # (B, N)
    h = jnp.maximum(z @ params["w1"].T + params["b1"], 0.0)
    s = jax.nn.sigmoid(h @ params["w2"].T + params["b2"])        # (B, N)
    u_sum = jnp.sum(u * s[:, :, None, None], axis=1)             # (B, L, D)
    return u_sum @ params["wp"].T + params["bp"]


def init_params(key, num_layers, hidden_size, output_size):
    n_half = num_layers // 2
    ks = jax.random.split(key, 8)

    def linear(kw, kb, fan_out, fan_in):
        bound = 1.0 / math.sqrt(fan_in)
        w = jax.random.uniform(kw, (fan_out, fan_in), minval=-bound, maxval=bound,
                               dtype=jnp.float32)
        b = jax.random.uniform(kb, (fan_out,), minval=-bound, maxval=bound,
                               dtype=jnp.float32)
        return w, b

    w_sq, b_sq = linear(ks[0], ks[1], 1, hidden_size)            # squeeze: D -> 1
    w1, b1 = linear(ks[2], ks[3], n_half, num_layers)            # W1: N -> N//2
    w2, b2 = linear(ks[4], ks[5], num_layers, n_half)            # W2: N//2 -> N
    wp, bp = linear(ks[6], ks[7], output_size, hidden_size)      # out proj: D -> D_out
    return {"w_sq": w_sq, "b_sq": b_sq, "w1": w1, "b1": b1,
            "w2": w2, "b2": b2, "wp": wp, "bp": bp}


if __name__ == "__main__":
    num_layers, hidden_size, output_size = 4, 32, 32
    B, L = 2, 8

    root = jax.random.PRNGKey(0)
    keys = jax.random.split(root, num_layers + 1)
    kp, kx = keys[0], keys[1:]
    encoder_outputs = [jax.random.normal(k, (B, L, hidden_size), dtype=jnp.float32)
                       for k in kx]
    params = init_params(kp, num_layers, hidden_size, output_size)

    out = layerwise_attention(encoder_outputs, params)
    out = jax.block_until_ready(out)

    ref = reference_forward(encoder_outputs, params)
    assert out.shape == (B, L, output_size)
    max_err = jnp.max(jnp.abs(out - ref))
    assert jnp.allclose(out, ref, atol=1e-4, rtol=1e-4), f"max abs diff {max_err}"

    print("KERNEL_OK")
</pallas_src>

<mosaic_0001>
module attributes {stable_mosaic.version = 11 : i64} {
  func.func @_layerwise_attention_kernel(%arg0: i32, %arg1: memref<2x4xf32, #tpu.memory_space<smem>>, %arg2: memref<2xf32, #tpu.memory_space<smem>>, %arg3: memref<4x2xf32, #tpu.memory_space<smem>>, %arg4: memref<4xf32, #tpu.memory_space<smem>>, %arg5: memref<1xf32, #tpu.memory_space<smem>>, %arg6: memref<2x4x8x32xf32, #tpu.memory_space<vmem>>, %arg7: memref<1x32xf32, #tpu.memory_space<vmem>>, %arg8: memref<32x32xf32, #tpu.memory_space<vmem>>, %arg9: memref<1x32xf32, #tpu.memory_space<vmem>>, %arg10: memref<2x8x32xf32, #tpu.memory_space<vmem>>) attributes {dimension_semantics = [#tpu.dimension_semantics<parallel>], iteration_bounds = array<i64: 1>, scalar_prefetch = 0 : i64, scratch_operands = 0 : i64, tpu.core_type = #tpu.core_type<tc>, window_params = [{transform_indices = @transform_0, window_bounds = array<i64: 2, 4>}, {transform_indices = @transform_1, window_bounds = array<i64: 2>}, {transform_indices = @transform_2, window_bounds = array<i64: 4, 2>}, {transform_indices = @transform_3, window_bounds = array<i64: 4>}, {transform_indices = @transform_4, window_bounds = array<i64: 1>}, {transform_indices = @transform_5, window_bounds = array<i64: 2, 4, 8, 32>}, {pipeline_mode = #tpu.pipeline_mode<synchronous>, transform_indices = @transform_6, window_bounds = array<i64: 1, 32>}, {pipeline_mode = #tpu.pipeline_mode<synchronous>, transform_indices = @transform_7, window_bounds = array<i64: 32, 32>}, {pipeline_mode = #tpu.pipeline_mode<synchronous>, transform_indices = @transform_8, window_bounds = array<i64: 1, 32>}, {transform_indices = @transform_9, window_bounds = array<i64: 2, 8, 32>}]} {
    %c0 = arith.constant 0 : index
    %c0_0 = arith.constant 0 : index
    %c0_1 = arith.constant 0 : index
    %c0_2 = arith.constant 0 : index
    %0 = vector.load %arg6[%c0, %c0_0, %c0_1, %c0_2] : memref<2x4x8x32xf32, #tpu.memory_space<vmem>>, vector<2x4x8x32xf32>
    %c0_3 = arith.constant 0 : index
    %c0_4 = arith.constant 0 : index
    %1 = vector.load %arg7[%c0_3, %c0_4] : memref<1x32xf32, #tpu.memory_space<vmem>>, vector<1x32xf32>
    %2 = vector.shape_cast %1 : vector<1x32xf32> to vector<1x1x32xf32>
    %c0_5 = arith.constant 0 : index
    %3 = memref.load %arg5[%c0_5] : memref<1xf32, #tpu.memory_space<smem>>
    %4 = vector.extract_strided_slice %0 {offsets = [0, 0, 0, 0], sizes = [2, 1, 8, 32], strides = [1, 1, 1, 1]} : vector<2x4x8x32xf32> to vector<2x1x8x32xf32>
    %5 = vector.shape_cast %4 : vector<2x1x8x32xf32> to vector<2x8x32xf32>
    %cst = arith.constant dense<0.000000e+00> : vector<2x32xf32>
    %6 = vector.multi_reduction <add>, %5, %cst [1] : vector<2x8x32xf32> to vector<2x32xf32>
    %7 = vector.shape_cast %6 : vector<2x32xf32> to vector<2x1x32xf32>
    %cst_6 = arith.constant 8.000000e+00 : f32
    %8 = vector.broadcast %cst_6 : f32 to vector<2x1x32xf32>
    %9 = arith.divf %7, %8 : vector<2x1x32xf32>
    %10 = vector.broadcast %2 : vector<1x1x32xf32> to vector<2x1x32xf32>
    %11 = arith.mulf %9, %10 : vector<2x1x32xf32>
    %cst_7 = arith.constant dense<0.000000e+00> : vector<2x1xf32>
    %12 = vector.multi_reduction <add>, %11, %cst_7 [2] : vector<2x1x32xf32> to vector<2x1xf32>
    %13 = vector.shape_cast %12 : vector<2x1xf32> to vector<2x1x1xf32>
    %14 = vector.broadcast %3 : f32 to vector<2x1x1xf32>
    %15 = arith.addf %13, %14 : vector<2x1x1xf32>
    %16 = vector.extract_strided_slice %0 {offsets = [0, 1, 0, 0], sizes = [2, 1, 8, 32], strides = [1, 1, 1, 1]} : vector<2x4x8x32xf32> to vector<2x1x8x32xf32>
    %17 = vector.shape_cast %16 : vector<2x1x8x32xf32> to vector<2x8x32xf32>
    %cst_8 = arith.constant dense<0.000000e+00> : vector<2x32xf32>
    %18 = vector.multi_reduction <add>, %17, %cst_8 [1] : vector<2x8x32xf32> to vector<2x32xf32>
    %19 = vector.shape_cast %18 : vector<2x32xf32> to vector<2x1x32xf32>
    %cst_9 = arith.constant 8.000000e+00 : f32
    %20 = vector.broadcast %cst_9 : f32 to vector<2x1x32xf32>
    %21 = arith.divf %19, %20 : vector<2x1x32xf32>
    %22 = vector.broadcast %2 : vector<1x1x32xf32> to vector<2x1x32xf32>
    %23 = arith.mulf %21, %22 : vector<2x1x32xf32>
    %cst_10 = arith.constant dense<0.000000e+00> : vector<2x1xf32>
    %24 = vector.multi_reduction <add>, %23, %cst_10 [2] : vector<2x1x32xf32> to vector<2x1xf32>
    %25 = vector.shape_cast %24 : vector<2x1xf32> to vector<2x1x1xf32>
    %26 = vector.broadcast %3 : f32 to vector<2x1x1xf32>
    %27 = arith.addf %25, %26 : vector<2x1x1xf32>
    %28 = vector.extract_strided_slice %0 {offsets = [0, 2, 0, 0], sizes = [2, 1, 8, 32], strides = [1, 1, 1, 1]} : vector<2x4x8x32xf32> to vector<2x1x8x32xf32>
    %29 = vector.shape_cast %28 : vector<2x1x8x32xf32> to vector<2x8x32xf32>
    %cst_11 = arith.constant dense<0.000000e+00> : vector<2x32xf32>
    %30 = vector.multi_reduction <add>, %29, %cst_11 [1] : vector<2x8x32xf32> to vector<2x32xf32>
    %31 = vector.shape_cast %30 : vector<2x32xf32> to vector<2x1x32xf32>
    %cst_12 = arith.constant 8.000000e+00 : f32
    %32 = vector.broadcast %cst_12 : f32 to vector<2x1x32xf32>
    %33 = arith.divf %31, %32 : vector<2x1x32xf32>
    %34 = vector.broadcast %2 : vector<1x1x32xf32> to vector<2x1x32xf32>
    %35 = arith.mulf %33, %34 : vector<2x1x32xf32>
    %cst_13 = arith.constant dense<0.000000e+00> : vector<2x1xf32>
    %36 = vector.multi_reduction <add>, %35, %cst_13 [2] : vector<2x1x32xf32> to vector<2x1xf32>
    %37 = vector.shape_cast %36 : vector<2x1xf32> to vector<2x1x1xf32>
    %38 = vector.broadcast %3 : f32 to vector<2x1x1xf32>
    %39 = arith.addf %37, %38 : vector<2x1x1xf32>
    %40 = vector.extract_strided_slice %0 {offsets = [0, 3, 0, 0], sizes = [2, 1, 8, 32], strides = [1, 1, 1, 1]} : vector<2x4x8x32xf32> to vector<2x1x8x32xf32>
    %41 = vector.shape_cast %40 : vector<2x1x8x32xf32> to vector<2x8x32xf32>
    %cst_14 = arith.constant dense<0.000000e+00> : vector<2x32xf32>
    %42 = vector.multi_reduction <add>, %41, %cst_14 [1] : vector<2x8x32xf32> to vector<2x32xf32>
    %43 = vector.shape_cast %42 : vector<2x32xf32> to vector<2x1x32xf32>
    %cst_15 = arith.constant 8.000000e+00 : f32
    %44 = vector.broadcast %cst_15 : f32 to vector<2x1x32xf32>
    %45 = arith.divf %43, %44 : vector<2x1x32xf32>
    %46 = vector.broadcast %2 : vector<1x1x32xf32> to vector<2x1x32xf32>
    %47 = arith.mulf %45, %46 : vector<2x1x32xf32>
    %cst_16 = arith.constant dense<0.000000e+00> : vector<2x1xf32>
    %48 = vector.multi_reduction <add>, %47, %cst_16 [2] : vector<2x1x32xf32> to vector<2x1xf32>
    %49 = vector.shape_cast %48 : vector<2x1xf32> to vector<2x1x1xf32>
    %50 = vector.broadcast %3 : f32 to vector<2x1x1xf32>
    %51 = arith.addf %49, %50 : vector<2x1x1xf32>
    %c0_17 = arith.constant 0 : index
    %c0_18 = arith.constant 0 : index
    %52 = memref.load %arg1[%c0_17, %c0_18] : memref<2x4xf32, #tpu.memory_space<smem>>
    %53 = vector.broadcast %52 : f32 to vector<2x1x1xf32>
    %54 = arith.mulf %15, %53 : vector<2x1x1xf32>
    %c0_19 = arith.constant 0 : index
    %55 = memref.load %arg2[%c0_19] : memref<2xf32, #tpu.memory_space<smem>>
    %56 = vector.broadcast %55 : f32 to vector<2x1x1xf32>
    %57 = arith.addf %54, %56 : vector<2x1x1xf32>
    %c0_20 = arith.constant 0 : index
    %c1 = arith.constant 1 : index
    %58 = memref.load %arg1[%c0_20, %c1] : memref<2x4xf32, #tpu.memory_space<smem>>
    %59 = vector.broadcast %58 : f32 to vector<2x1x1xf32>
    %60 = arith.mulf %59, %27 : vector<2x1x1xf32>
    %61 = arith.addf %57, %60 : vector<2x1x1xf32>
    %c0_21 = arith.constant 0 : index
    %c2 = arith.constant 2 : index
    %62 = memref.load %arg1[%c0_21, %c2] : memref<2x4xf32, #tpu.memory_space<smem>>
    %63 = vector.broadcast %62 : f32 to vector<2x1x1xf32>
    %64 = arith.mulf %63, %39 : vector<2x1x1xf32>
    %65 = arith.addf %61, %64 : vector<2x1x1xf32>
    %c0_22 = arith.constant 0 : index
    %c3 = arith.constant 3 : index
    %66 = memref.load %arg1[%c0_22, %c3] : memref<2x4xf32, #tpu.memory_space<smem>>
    %67 = vector.broadcast %66 : f32 to vector<2x1x1xf32>
    %68 = arith.mulf %67, %51 : vector<2x1x1xf32>
    %69 = arith.addf %65, %68 : vector<2x1x1xf32>
    %cst_23 = arith.constant 0.000000e+00 : f32
    %70 = vector.broadcast %cst_23 : f32 to vector<2x1x1xf32>
    %71 = arith.maximumf %69, %70 : vector<2x1x1xf32>
    %c1_24 = arith.constant 1 : index
    %c0_25 = arith.constant 0 : index
    %72 = memref.load %arg1[%c1_24, %c0_25] : memref<2x4xf32, #tpu.memory_space<smem>>
    %73 = vector.broadcast %72 : f32 to vector<2x1x1xf32>
    %74 = arith.mulf %15, %73 : vector<2x1x1xf32>
    %c1_26 = arith.constant 1 : index
    %75 = memref.load %arg2[%c1_26] : memref<2xf32, #tpu.memory_space<smem>>
    %76 = vector.broadcast %75 : f32 to vector<2x1x1xf32>
    %77 = arith.addf %74, %76 : vector<2x1x1xf32>
    %c1_27 = arith.constant 1 : index
    %c1_28 = arith.constant 1 : index
    %78 = memref.load %arg1[%c1_27, %c1_28] : memref<2x4xf32, #tpu.memory_space<smem>>
    %79 = vector.broadcast %78 : f32 to vector<2x1x1xf32>
    %80 = arith.mulf %79, %27 : vector<2x1x1xf32>
    %81 = arith.addf %77, %80 : vector<2x1x1xf32>
    %c1_29 = arith.constant 1 : index
    %c2_30 = arith.constant 2 : index
    %82 = memref.load %arg1[%c1_29, %c2_30] : memref<2x4xf32, #tpu.memory_space<smem>>
    %83 = vector.broadcast %82 : f32 to vector<2x1x1xf32>
    %84 = arith.mulf %83, %39 : vector<2x1x1xf32>
    %85 = arith.addf %81, %84 : vector<2x1x1xf32>
    %c1_31 = arith.constant 1 : index
    %c3_32 = arith.constant 3 : index
    %86 = memref.load %arg1[%c1_31, %c3_32] : memref<2x4xf32, #tpu.memory_space<smem>>
    %87 = vector.broadcast %86 : f32 to vector<2x1x1xf32>
    %88 = arith.mulf %87, %51 : vector<2x1x1xf32>
    %89 = arith.addf %85, %88 : vector<2x1x1xf32>
    %cst_33 = arith.constant 0.000000e+00 : f32
    %90 = vector.broadcast %cst_33 : f32 to vector<2x1x1xf32>
    %91 = arith.maximumf %89, %90 : vector<2x1x1xf32>
    %c0_34 = arith.constant 0 : index
    %c0_35 = arith.constant 0 : index
    %92 = memref.load %arg3[%c0_34, %c0_35] : memref<4x2xf32, #tpu.memory_space<smem>>
    %93 = vector.broadcast %92 : f32 to vector<2x1x1xf32>
    %94 = arith.mulf %71, %93 : vector<2x1x1xf32>
    %c0_36 = arith.constant 0 : index
    %95 = memref.load %arg4[%c0_36] : memref<4xf32, #tpu.memory_space<smem>>
    %96 = vector.broadcast %95 : f32 to vector<2x1x1xf32>
    %97 = arith.addf %94, %96 : vector<2x1x1xf32>
    %c0_37 = arith.constant 0 : index
    %c1_38 = arith.constant 1 : index
    %98 = memref.load %arg3[%c0_37, %c1_38] : memref<4x2xf32, #tpu.memory_space<smem>>
    %99 = vector.broadcast %98 : f32 to vector<2x1x1xf32>
    %100 = arith.mulf %99, %91 : vector<2x1x1xf32>
    %101 = arith.addf %97, %100 : vector<2x1x1xf32>
    %102 = arith.negf %101 : vector<2x1x1xf32>
    %103 = math.exp %102 : vector<2x1x1xf32>
    %cst_39 = arith.constant 1.000000e+00 : f32
    %104 = vector.broadcast %cst_39 : f32 to vector<2x1x1xf32>
    %105 = arith.addf %104, %103 : vector<2x1x1xf32>
    %106 = arith.divf %104, %105 : vector<2x1x1xf32>
    %c1_40 = arith.constant 1 : index
    %c0_41 = arith.constant 0 : index
    %107 = memref.load %arg3[%c1_40, %c0_41] : memref<4x2xf32, #tpu.memory_space<smem>>
    %108 = vector.broadcast %107 : f32 to vector<2x1x1xf32>
    %109 = arith.mulf %71, %108 : vector<2x1x1xf32>
    %c1_42 = arith.constant 1 : index
    %110 = memref.load %arg4[%c1_42] : memref<4xf32, #tpu.memory_space<smem>>
    %111 = vector.broadcast %110 : f32 to vector<2x1x1xf32>
    %112 = arith.addf %109, %111 : vector<2x1x1xf32>
    %c1_43 = arith.constant 1 : index
    %c1_44 = arith.constant 1 : index
    %113 = memref.load %arg3[%c1_43, %c1_44] : memref<4x2xf32, #tpu.memory_space<smem>>
    %114 = vector.broadcast %113 : f32 to vector<2x1x1xf32>
    %115 = arith.mulf %114, %91 : vector<2x1x1xf32>
    %116 = arith.addf %112, %115 : vector<2x1x1xf32>
    %117 = arith.negf %116 : vector<2x1x1xf32>
    %118 = math.exp %117 : vector<2x1x1xf32>
    %cst_45 = arith.constant 1.000000e+00 : f32
    %119 = vector.broadcast %cst_45 : f32 to vector<2x1x1xf32>
    %120 = arith.addf %119, %118 : vector<2x1x1xf32>
    %121 = arith.divf %119, %120 : vector<2x1x1xf32>
    %c2_46 = arith.constant 2 : index
    %c0_47 = arith.constant 0 : index
    %122 = memref.load %arg3[%c2_46, %c0_47] : memref<4x2xf32, #tpu.memory_space<smem>>
    %123 = vector.broadcast %122 : f32 to vector<2x1x1xf32>
    %124 = arith.mulf %71, %123 : vector<2x1x1xf32>
    %c2_48 = arith.constant 2 : index
    %125 = memref.load %arg4[%c2_48] : memref<4xf32, #tpu.memory_space<smem>>
    %126 = vector.broadcast %125 : f32 to vector<2x1x1xf32>
    %127 = arith.addf %124, %126 : vector<2x1x1xf32>
    %c2_49 = arith.constant 2 : index
    %c1_50 = arith.constant 1 : index
    %128 = memref.load %arg3[%c2_49, %c1_50] : memref<4x2xf32, #tpu.memory_space<smem>>
    %129 = vector.broadcast %128 : f32 to vector<2x1x1xf32>
    %130 = arith.mulf %129, %91 : vector<2x1x1xf32>
    %131 = arith.addf %127, %130 : vector<2x1x1xf32>
    %132 = arith.negf %131 : vector<2x1x1xf32>
    %133 = math.exp %132 : vector<2x1x1xf32>
    %cst_51 = arith.constant 1.000000e+00 : f32
    %134 = vector.broadcast %cst_51 : f32 to vector<2x1x1xf32>
    %135 = arith.addf %134, %133 : vector<2x1x1xf32>
    %136 = arith.divf %134, %135 : vector<2x1x1xf32>
    %c3_52 = arith.constant 3 : index
    %c0_53 = arith.constant 0 : index
    %137 = memref.load %arg3[%c3_52, %c0_53] : memref<4x2xf32, #tpu.memory_space<smem>>
    %138 = vector.broadcast %137 : f32 to vector<2x1x1xf32>
    %139 = arith.mulf %71, %138 : vector<2x1x1xf32>
    %c3_54 = arith.constant 3 : index
    %140 = memref.load %arg4[%c3_54] : memref<4xf32, #tpu.memory_space<smem>>
    %141 = vector.broadcast %140 : f32 to vector<2x1x1xf32>
    %142 = arith.addf %139, %141 : vector<2x1x1xf32>
    %c3_55 = arith.constant 3 : index
    %c1_56 = arith.constant 1 : index
    %143 = memref.load %arg3[%c3_55, %c1_56] : memref<4x2xf32, #tpu.memory_space<smem>>
    %144 = vector.broadcast %143 : f32 to vector<2x1x1xf32>
    %145 = arith.mulf %144, %91 : vector<2x1x1xf32>
    %146 = arith.addf %142, %145 : vector<2x1x1xf32>
    %147 = arith.negf %146 : vector<2x1x1xf32>
    %148 = math.exp %147 : vector<2x1x1xf32>
    %cst_57 = arith.constant 1.000000e+00 : f32
    %149 = vector.broadcast %cst_57 : f32 to vector<2x1x1xf32>
    %150 = arith.addf %149, %148 : vector<2x1x1xf32>
    %151 = arith.divf %149, %150 : vector<2x1x1xf32>
    %152 = vector.extract_strided_slice %0 {offsets = [0, 0, 0, 0], sizes = [2, 1, 8, 32], strides = [1, 1, 1, 1]} : vector<2x4x8x32xf32> to vector<2x1x8x32xf32>
    %153 = vector.shape_cast %152 : vector<2x1x8x32xf32> to vector<2x8x32xf32>
    %154 = vector.broadcast %106 : vector<2x1x1xf32> to vector<2x8x32xf32>
    %155 = arith.mulf %154, %153 : vector<2x8x32xf32>
    %156 = vector.extract_strided_slice %0 {offsets = [0, 1, 0, 0], sizes = [2, 1, 8, 32], strides = [1, 1, 1, 1]} : vector<2x4x8x32xf32> to vector<2x1x8x32xf32>
    %157 = vector.shape_cast %156 : vector<2x1x8x32xf32> to vector<2x8x32xf32>
    %158 = vector.broadcast %121 : vector<2x1x1xf32> to vector<2x8x32xf32>
    %159 = arith.mulf %158, %157 : vector<2x8x32xf32>
    %160 = arith.addf %155, %159 : vector<2x8x32xf32>
    %161 = vector.extract_strided_slice %0 {offsets = [0, 2, 0, 0], sizes = [2, 1, 8, 32], strides = [1, 1, 1, 1]} : vector<2x4x8x32xf32> to vector<2x1x8x32xf32>
    %162 = vector.shape_cast %161 : vector<2x1x8x32xf32> to vector<2x8x32xf32>
    %163 = vector.broadcast %136 : vector<2x1x1xf32> to vector<2x8x32xf32>
    %164 = arith.mulf %163, %162 : vector<2x8x32xf32>
    %165 = arith.addf %160, %164 : vector<2x8x32xf32>
    %166 = vector.extract_strided_slice %0 {offsets = [0, 3, 0, 0], sizes = [2, 1, 8, 32], strides = [1, 1, 1, 1]} : vector<2x4x8x32xf32> to vector<2x1x8x32xf32>
    %167 = vector.shape_cast %166 : vector<2x1x8x32xf32> to vector<2x8x32xf32>
    %168 = vector.broadcast %151 : vector<2x1x1xf32> to vector<2x8x32xf32>
    %169 = arith.mulf %168, %167 : vector<2x8x32xf32>
    %170 = arith.addf %165, %169 : vector<2x8x32xf32>
    %c0_58 = arith.constant 0 : index
    %c0_59 = arith.constant 0 : index
    %171 = vector.load %arg8[%c0_58, %c0_59] : memref<32x32xf32, #tpu.memory_space<vmem>>, vector<32x32xf32>
    %c0_60 = arith.constant 0 : index
    %c0_61 = arith.constant 0 : index
    %172 = vector.load %arg9[%c0_60, %c0_61] : memref<1x32xf32, #tpu.memory_space<vmem>>, vector<1x32xf32>
    %173 = vector.shape_cast %170 : vector<2x8x32xf32> to vector<16x32xf32>
    %cst_62 = arith.constant dense<0.000000e+00> : vector<16x32xf32>
    %174 = tpu.matmul %173, %171, %cst_62 {dimension_numbers = #tpu.dot_dimension_numbers<[1], [0], [0], [1], [0, 0, 1, 1], [], []>} : vector<16x32xf32>, vector<32x32xf32>, vector<16x32xf32> -> vector<16x32xf32>
    %175 = vector.broadcast %172 : vector<1x32xf32> to vector<16x32xf32>
    %176 = arith.addf %174, %175 : vector<16x32xf32>
    %177 = vector.shape_cast %176 : vector<16x32xf32> to vector<2x8x32xf32>
    %c0_63 = arith.constant 0 : index
    %c0_64 = arith.constant 0 : index
    %c0_65 = arith.constant 0 : index
    %178 = vector.load %arg10[%c0_63, %c0_64, %c0_65] : memref<2x8x32xf32, #tpu.memory_space<vmem>>, vector<2x8x32xf32>
    tpu.vector_store %arg10[%c0_63, %c0_64, %c0_65], %177 {strides = array<i32>} : memref<2x8x32xf32, #tpu.memory_space<vmem>>, vector<2x8x32xf32>,
    return
  }
  func.func @transform_0(%arg0: i32) -> (i32, i32) {
    %c0_i32 = arith.constant 0 : i32
    %c0_i32_0 = arith.constant 0 : i32
    %c0_i32_1 = arith.constant 0 : i32
    return %c0_i32, %c0_i32_0 : i32, i32
  }
  func.func @transform_1(%arg0: i32) -> i32 {
    %c0_i32 = arith.constant 0 : i32
    %c0_i32_0 = arith.constant 0 : i32
    return %c0_i32 : i32
  }
  func.func @transform_2(%arg0: i32) -> (i32, i32) {
    %c0_i32 = arith.constant 0 : i32
    %c0_i32_0 = arith.constant 0 : i32
    %c0_i32_1 = arith.constant 0 : i32
    return %c0_i32, %c0_i32_0 : i32, i32
  }
  func.func @transform_3(%arg0: i32) -> i32 {
    %c0_i32 = arith.constant 0 : i32
    %c0_i32_0 = arith.constant 0 : i32
    return %c0_i32 : i32
  }
  func.func @transform_4(%arg0: i32) -> i32 {
    %c0_i32 = arith.constant 0 : i32
    %c0_i32_0 = arith.constant 0 : i32
    return %c0_i32 : i32
  }
  func.func @transform_5(%arg0: i32) -> (i32, i32, i32, i32) {
    %c0_i32 = arith.constant 0 : i32
    %c0_i32_0 = arith.constant 0 : i32
    %c0_i32_1 = arith.constant 0 : i32
    %c0_i32_2 = arith.constant 0 : i32
    return %arg0, %c0_i32, %c0_i32_0, %c0_i32_1 : i32, i32, i32, i32
  }
  func.func @transform_6(%arg0: i32) -> (i32, i32) {
    %c0_i32 = arith.constant 0 : i32
    %c0_i32_0 = arith.constant 0 : i32
    %c0_i32_1 = arith.constant 0 : i32
    return %c0_i32, %c0_i32_0 : i32, i32
  }
  func.func @transform_7(%arg0: i32) -> (i32, i32) {
    %c0_i32 = arith.constant 0 : i32
    %c0_i32_0 = arith.constant 0 : i32
    %c0_i32_1 = arith.constant 0 : i32
    return %c0_i32, %c0_i32_0 : i32, i32
  }
  func.func @transform_8(%arg0: i32) -> (i32, i32) {
    %c0_i32 = arith.constant 0 : i32
    %c0_i32_0 = arith.constant 0 : i32
    %c0_i32_1 = arith.constant 0 : i32
    return %c0_i32, %c0_i32_0 : i32, i32
  }
  func.func @transform_9(%arg0: i32) -> (i32, i32, i32) {
    %c0_i32 = arith.constant 0 : i32
    %c0_i32_0 = arith.constant 0 : i32
    %c0_i32_1 = arith.constant 0 : i32
    return %arg0, %c0_i32, %c0_i32_0 : i32, i32, i32
  }
}

</mosaic_0001>

<bundles_post_ra>
// kernel: tpu_custom_call.1
= control target key start
LH: loop header
LB: loop body
LE: loop exit
PB: predicated region body
PF: predicated region fallthrough
CT: control target
= control target key end

     0   :  { %15 = vsyncpa [#allocation6], 0  ;;  %s1125_s0 = inlined_call_operand.hbm [shape: f32[2,4], index: 0, kind: input, shape index: {}]   ;;  %s1126_s1 = inlined_call_operand.hbm [shape: f32[2], index: 1, kind: input, shape index: {}]   ;;  %s1127_s2 = inlined_call_operand.hbm [shape: f32[4,2], index: 2, kind: input, shape index: {}]   ;;  %s1128_s3 = inlined_call_operand.hbm [shape: f32[4], index: 3, kind: input, shape index: {}]   ;;  %s1129_s4 = inlined_call_operand.<no memory space> [shape: f32[1], index: 4, kind: input, shape index: {}]   ;;  %s1130_s5 = inlined_call_operand.hbm [shape: f32[2,4,8,32], index: 5, kind: input, shape index: {}]   ;;  %s1131_s6 = inlined_call_operand.hbm [shape: f32[1,32], index: 6, kind: input, shape index: {}]   ;;  %s1132_s7 = inlined_call_operand.hbm [shape: f32[32,32], index: 7, kind: input, shape index: {}]   ;;  %s1133_s8 = inlined_call_operand.hbm [shape: f32[1,32], index: 8, kind: input, shape index: {}]   ;;  %s1134_s9 = inlined_call_operand.hbm [shape: f32[2,8,32], index: 9, kind: output, shape index: {}]  }
   0x1   :  { %16 = vsyncpa [#allocation8], 0 }
   0x2   :  { %17 = vsyncpa [#allocation11], 0 }
   0x3   :  { %18 = vsyncpa [#allocation4], 0 }
   0x4   :  { %19 = vsyncpa [#allocation14], 0 }
   0x5   :  { %20 = vsyncpa [#allocation17], 0 }
   0x6   :  { %21 = vsyncpa [#allocation5], 0  ;;  %s662_s11 = scalar_lea.hbm %s1126_s1, 16 }
   0x7   :  { %p663_p0 = scmp.ne.s32.totalorder %s1126_s1, %s662_s11  ;;  %p666_p1 = scmp.lt.u32.totalorder %s662_s11, %s1126_s1 }
   0x9   :  { %p668_p2 = pnand %p666_p1, %p663_p0 }
   0xb   :  { %671 = shalt.err (!%p668_p2)
}
   0xc   :  { %s826_s16 = smov [#allocation7]   ;;  %s827_s19 = smov [#allocation13]  }
   0xd   :  { %37 = dma.hbm_to_smem %s1126_s1, 16, %s826_s16, [#allocation8]  }
   0xe   :  { %s74_s20 = sshll.u32 %s827_s19, 4  ;;  %s672_s23 = scalar_lea.hbm %s1131_s6, 16  ;;  %s75_s20 = int_to_ptr.vmem [resolvable:$true] %s74_s20 }
   0xf   :  { %p673_p3 = scmp.ne.s32.totalorder %s1131_s6, %s672_s23  ;;  %p676_p4 = scmp.lt.u32.totalorder %s672_s23, %s1131_s6 }
  0x11   :  { %p678_p5 = pnand %p676_p4, %p673_p3 }
  0x13   :  { %681 = shalt.err (!%p678_p5)
}
  0x14   :  { %s682_s28 = scalar_lea.vmem %s75_s20, 16  ;;  %s686_s1 = scalar_lea.vmem %s75_s20, 32 }
  0x15   :  { %p683_p6 = scmp.ne.s32.totalorder %s75_s20, %s682_s28  ;;  %p687_p7 = scmp.lt.s32.totalorder %s75_s20, %s75_s20 }
  0x16   :  { %p688_p8 = scmp.lt.s32.totalorder %s686_s1, %s682_s28 }
  0x18   :  { %p689_p9 = por %p688_p8, %p687_p7 }
  0x1a   :  { %p690_p10 = pnand %p689_p9, %p683_p6 }
  0x1c   :  { %693 = shalt.err (!%p690_p10)
}
  0x1d   :  { %77 = dma.hbm_to_vmem [thread:$0]  %s1131_s6, 16, %s75_s20, [#allocation14]  }
  0x1e   :  { %s694_s12 = scalar_lea.hbm %s1125_s0, 32 }
  0x1f   :  { %p695_p11 = scmp.ne.s32.totalorder %s1125_s0, %s694_s12  ;;  %p698_p12 = scmp.lt.u32.totalorder %s694_s12, %s1125_s0 }
  0x21   :  { %p700_p13 = pnand %p698_p12, %p695_p11 }
  0x23   :  { %703 = shalt.err (!%p700_p13)
}
  0x24   :  { %s828_s17 = smov [#allocation3]   ;;  %s704_s21 = scalar_lea.hbm %s1127_s2, 64 }
  0x25   :  { %29 = dma.hbm_to_smem %s1125_s0, 32, %s828_s17, [#allocation6]  }
  0x26   :  { %p705_p0 = scmp.ne.s32.totalorder %s1127_s2, %s704_s21  ;;  %p708_p1 = scmp.lt.u32.totalorder %s704_s21, %s1127_s2 }
  0x28   :  { %p710_p2 = pnand %p708_p1, %p705_p0 }
  0x2a   :  { %713 = shalt.err (!%p710_p2)
}
  0x2b   :  { %s829_s26 = smov [#allocation9]   ;;  %s714_s29 = scalar_lea.hbm %s1128_s3, 16 }
  0x2c   :  { %45 = dma.hbm_to_smem %s1127_s2, 64, %s829_s26, [#allocation8]  }
  0x2d   :  { %p715_p3 = scmp.ne.s32.totalorder %s1128_s3, %s714_s29  ;;  %p718_p4 = scmp.lt.u32.totalorder %s714_s29, %s1128_s3 }
  0x2f   :  { %p720_p5 = pnand %p718_p4, %p715_p3 }
  0x31   :  { %723 = shalt.err (!%p720_p5)
}
  0x32   :  { %s830_s13 = smov [#allocation10]   ;;  %s831_s2 = smov [#allocation12]  }
  0x33   :  { %53 = dma.hbm_to_smem %s1128_s3, 16, %s830_s13, [#allocation11]  }
  0x34   :  { %s61_s16 = sshll.u32 %s831_s2, 4  ;;  %s724_s19 = scalar_lea.hbm %s1130_s5, 1024  ;;  %s62_s16 = int_to_ptr.vmem [resolvable:$true] %s61_s16 }
  0x35   :  { %p725_p6 = scmp.ne.s32.totalorder %s1130_s5, %s724_s19  ;;  %p728_p7 = scmp.lt.u32.totalorder %s724_s19, %s1130_s5 }
  0x37   :  { %p730_p8 = pnand %p728_p7, %p725_p6 }
  0x39   :  { %733 = shalt.err (!%p730_p8)
}
  0x3a   :  { %s734_s23 = scalar_lea.vmem %s62_s16, 1024  ;;  %p739_p10 = scmp.lt.s32.totalorder %s62_s16, %s62_s16 }
  0x3b   :  { %p735_p9 = scmp.ne.s32.totalorder %s62_s16, %s734_s23  ;;  %p740_p11 = scmp.lt.s32.totalorder %s734_s23, %s734_s23 }
  0x3d   :  { %p741_p12 = por %p740_p11, %p739_p10 }
  0x3f   :  { %p742_p13 = pnand %p741_p12, %p735_p9 }
  0x41   :  { %745 = shalt.err (!%p742_p13)
}
  0x42   :  { %s832_s3 = smov 128   ;;  %s833_s24 = smov 8  }
  0x43   :  { %67 = dma.hbm_to_vmem [thread:$0]  %s1130_s5, 1024, %s62_s16, [#allocation4], %s832_s3, %s832_s3, %s833_s24  }
  0x44   :  { %s834_s27 = smov [#allocation15]   ;;  %s835_s0 = smov [#allocation16]  }
  0x45   :  { %s83_s28 = sshll.u32 %s834_s27, 4  ;;  %s96_s1 = sshll.u32 %s835_s0, 4  ;;  %s84_s28 = int_to_ptr.vmem [resolvable:$true] %s83_s28  ;;  %s97_s1 = int_to_ptr.vmem [resolvable:$true] %s96_s1 }
  0x46   :  { %s746_s10 = scalar_lea.hbm %s1132_s7, 512 }
  0x47   :  { %p747_p0 = scmp.ne.s32.totalorder %s1132_s7, %s746_s10  ;;  %p750_p1 = scmp.lt.u32.totalorder %s746_s10, %s1132_s7 }
  0x49   :  { %p752_p2 = pnand %p750_p1, %p747_p0 }
  0x4b   :  { %755 = shalt.err (!%p752_p2)
}
  0x4c   :  { %s756_s5 = scalar_lea.vmem %s84_s28, 512  ;;  %p761_p4 = scmp.lt.s32.totalorder %s84_s28, %s84_s28 }
  0x4d   :  { %p757_p3 = scmp.ne.s32.totalorder %s84_s28, %s756_s5  ;;  %p762_p5 = scmp.lt.s32.totalorder %s756_s5, %s756_s5 }
  0x4f   :  { %p763_p6 = por %p762_p5, %p761_p4 }
  0x51   :  { %p764_p7 = pnand %p763_p6, %p757_p3 }
  0x53   :  { %767 = shalt.err (!%p764_p7)
}
  0x54   :  { %89 = dma.hbm_to_vmem [thread:$0]  %s1132_s7, 512, %s84_s28, [#allocation14], %s832_s3, %s832_s3, %s833_s24  }
  0x55   :  { %s768_s18 = scalar_lea.hbm %s1133_s8, 16 }
  0x56   :  { %p769_p8 = scmp.ne.s32.totalorder %s1133_s8, %s768_s18  ;;  %p772_p9 = scmp.lt.u32.totalorder %s768_s18, %s1133_s8 }
  0x58   :  { %p774_p10 = pnand %p772_p9, %p769_p8 }
  0x5a   :  { %777 = shalt.err (!%p774_p10)
}
  0x5b   :  { %s778_s22 = scalar_lea.vmem %s97_s1, 16  ;;  %s782_s23 = scalar_lea.vmem %s97_s1, 32 }
  0x5c   :  { %p779_p11 = scmp.ne.s32.totalorder %s97_s1, %s778_s22  ;;  %p783_p12 = scmp.lt.s32.totalorder %s97_s1, %s97_s1 }
  0x5d   :  { %p784_p13 = scmp.lt.s32.totalorder %s782_s23, %s778_s22 }
  0x5f   :  { %p785_p0 = por %p784_p13, %p783_p12 }
  0x61   :  { %p786_p1 = pnand %p785_p0, %p779_p11 }
  0x63   :  { %789 = shalt.err (!%p786_p1)
}
  0x64   :  { %99 = dma.hbm_to_vmem [thread:$0]  %s1133_s8, 16, %s97_s1, [#allocation17]  }
  0x65   :  { %812 = dma.done.wait [#allocation6], 32  }
  0x66   :  { %813 = vsyncadd [#allocation6], 4294967264 }
  0x67   :  { %814 = dma.done.wait [#allocation8], 80  }
  0x68   :  { %815 = vsyncadd [#allocation8], 4294967216 }
  0x69   :  { %816 = dma.done.wait [#allocation11], 16  }
  0x6a   :  { %817 = vsyncadd [#allocation11], 4294967280 }
  0x6b   :  { %818 = dma.done.wait [#allocation4], 1024  }
  0x6c   :  { %819 = vsyncadd [#allocation4], 4294966272 }
  0x6d   :  { %820 = dma.done.wait [#allocation14], 528  }
  0x6e   :  { %821 = vsyncadd [#allocation14], 4294966768 }
  0x6f   :  { %822 = dma.done.wait [#allocation17], 16  }
  0x70   :  { %823 = vsyncadd [#allocation17], 4294967280 }
  0x71   :  { %124 = sfence }
  0x72   :  { %v989_v0 = vld [vmem:[#allocation12 + $0x8] sm:$0xff]  ;;  %vm135_vm0 = vcmask 261120   ;;  %v991_v1 = vld [vmem:[#allocation12] sm:$0xff]  ;;  %v1001_v6 = vld [vmem:[#allocation12 + $0x30] sm:$0xff]  ;;  %vm155_vm1 = vcmask 253952   ;;  %s1029_s8 = sld [smem:[#allocation3]] }
  0x73   :  { %v165_v2 = vsel %vm135_vm0, %v989_v0, 0.0  ;;  %v136_v3 = vsel %vm135_vm0, %v991_v1, 0.0  ;;  %v997_v4 = vld [vmem:[#allocation12 + $0x28] sm:$0xff]  ;;  %v999_v5 = vld [vmem:[#allocation12 + $0x20] sm:$0xff]  ;;  %v1007_v11 = vld [vmem:[#allocation12 + $0x10] sm:$0xff]  ;;  %v198_v15 = vsel %vm135_vm0, %v1001_v6, 0.0 }
  0x74   :  { %v166_v7 = vrot.slane %v165_v2, 4  ;;  %v137_v8 = vrot.slane %v136_v3, 4  ;;  %v172_v9 = vsel %vm135_vm0, %v997_v4, 0.0  ;;  %v143_v10 = vsel %vm135_vm0, %v999_v5, 0.0  ;;  %v1009_v12 = vld [vmem:[#allocation12 + $0x38] sm:$0xff]  ;;  %s1031_s26 = sld [smem:[#allocation3 + $0x80]] }
  0x75   :  { %v173_v13 = vrot.slane %v172_v9, 4  ;;  %v144_v14 = vrot.slane %v143_v10, 4  ;;  %v191_v16 = vsel %vm135_vm0, %v1007_v11, 0.0  ;;  %v1015_v17 = vld [vmem:[#allocation12 + $0x18] sm:$0xff]  ;;  %v199_v20 = vrot.slane %v198_v15, 4  ;;  %s1033_s27 = sld [smem:[#allocation3 + $0x1]] }
  0x76   :  { %v167_v18 = vadd.f32 %v166_v7, %v165_v2  ;;  %v138_v19 = vadd.f32 %v137_v8, %v136_v3  ;;  %v192_v21 = vrot.slane %v191_v16, 4  ;;  %v224_v24 = vsel %vm135_vm0, %v1009_v12, 0.0  ;;  %v133_v54 = vld [vmem:[#allocation13] sm:$0x1]  ;;  %s1035_s28 = sld [smem:[#allocation3 + $0x81]]  ;;  %s1037_s0 = sld [smem:[#allocation7]] }
  0x77   :  { %v174_v22 = vadd.f32 %v173_v13, %v172_v9  ;;  %v145_v23 = vadd.f32 %v144_v14, %v143_v10  ;;  %v217_v25 = vsel %vm135_vm0, %v1015_v17, 0.0  ;;  %v200_v28 = vadd.f32 %v199_v20, %v198_v15  ;;  %s1039_s1 = sld [smem:[#allocation7 + $0x1]]  ;;  %s1044_s10 = sld [smem:[#allocation3 + $0x2]] }
  0x78   :  { %v168_v26 = vrot.slane %v167_v18, 2  ;;  %v139_v27 = vrot.slane %v138_v19, 2  ;;  %v193_v29 = vadd.f32 %v192_v21, %v191_v16  ;;  %v225_v32 = vrot.slane %v224_v24, 4  ;;  %s1046_s11 = sld [smem:[#allocation3 + $0x82]]  ;;  %s1050_s12 = sld [smem:[#allocation3 + $0x3]] }
  0x79   :  { %v175_v30 = vrot.slane %v174_v22, 2  ;;  %v146_v31 = vrot.slane %v145_v23, 2  ;;  %v218_v33 = vrot.slane %v217_v25, 4  ;;  %v201_v36 = vrot.slane %v200_v28, 2  ;;  %s1052_s13 = sld [smem:[#allocation3 + $0x83]]  ;;  %s1062_s14 = sld [smem:[#allocation9 + $0x1]] }
  0x7a   :  { %v169_v34 = vadd.f32 %v168_v26, %v167_v18  ;;  %v140_v35 = vadd.f32 %v139_v27, %v138_v19  ;;  %v194_v37 = vrot.slane %v193_v29, 2  ;;  %v226_v40 = vadd.f32 %v225_v32, %v224_v24  ;;  %s1064_s5 = sld [smem:[#allocation9 + $0x80]]  ;;  %s1066_s15 = sld [smem:[#allocation9 + $0x81]] }
  0x7b   :  { %v176_v38 = vadd.f32 %v175_v30, %v174_v22  ;;  %v147_v39 = vadd.f32 %v146_v31, %v145_v23  ;;  %v219_v41 = vadd.f32 %v218_v33, %v217_v25  ;;  %v202_v44 = vadd.f32 %v201_v36, %v200_v28  ;;  %v449_v33 = vld [vmem:[#allocation15] sm:$0xff]  ;;  %s1068_s2 = sld [smem:[#allocation9 + $0x100]]  ;;  %s1070_s16 = sld [smem:[#allocation9 + $0x101]] }
  0x7c   :  { %v170_v42 = vrot.slane %v169_v34, 1  ;;  %v141_v43 = vrot.slane %v140_v35, 1  ;;  %v195_v45 = vadd.f32 %v194_v37, %v193_v29  ;;  %v227_v48 = vrot.slane %v226_v40, 2  ;;  %v452_v37 = vld [vmem:[#allocation15 + $0x18] sm:$0xff]  ;;  %s1074_s17 = sld [smem:[#allocation9 + $0x180]]  ;;  %s1076_s18 = sld [smem:[#allocation9 + $0x181]] }
  0x7d   :  { %v177_v46 = vrot.slane %v176_v38, 1  ;;  %v148_v47 = vrot.slane %v147_v39, 1  ;;  %v220_v49 = vrot.slane %v219_v41, 2  ;;  %v203_v52 = vrot.slane %v202_v44, 1  ;;  %s1078_s19 = sld [smem:[#allocation10]]  ;;  %s1080_s6 = sld [smem:[#allocation10 + $0x1]] }
  0x7e   :  { %v171_v50 = vadd.f32 %v170_v42, %v169_v34  ;;  %v142_v51 = vadd.f32 %v141_v43, %v140_v35  ;;  %v196_v53 = vrot.slane %v195_v45, 1  ;;  %v228_v57 = vadd.f32 %v227_v48, %v226_v40  ;;  %v450_v34 = vld [vmem:[#allocation15 + $0x8] sm:$0xff]  ;;  %v451_v35 = vld [vmem:[#allocation15 + $0x10] sm:$0xff]  ;;  %s1082_s20 = sld [smem:[#allocation10 + $0x2]]  ;;  %s1084_s21 = sld [smem:[#allocation10 + $0x3]] }
  0x7f   :  { %v178_v55 = vadd.f32 %v177_v46, %v176_v38  ;;  %v149_v56 = vadd.f32 %v148_v47, %v147_v39  ;;  %v221_v58 = vadd.f32 %v220_v49, %v219_v41  ;;  %v204_v61 = vadd.f32 %v203_v52, %v202_v44  ;;  %s836_s22 = smov [#allocation18]  }
  0x80   :  { %v179_v59 = vmul.f32 0.125, %v171_v50  ;;  %v151_v60 = vmul.f32 0.125, %v142_v51  ;;  %v197_v62 = vadd.f32 %v196_v53, %v195_v45  ;;  %v229_v3 = vrot.slane %v228_v57, 1  ;;  %s548_s23 = sshll.u32 %s836_s22, 4  ;;  %s549_s23 = int_to_ptr.vmem [resolvable:$true] %s548_s23 }
  0x81   :  { %v180_v63 = vmul.f32 0.125, %v178_v55  ;;  %v152_v2 = vmul.f32 0.125, %v149_v56  ;;  %v222_v7 = vrot.slane %v221_v58, 1  ;;  %v206_v10 = vmul.f32 0.125, %v204_v61  ;;  %s790_s7 = scalar_lea.vmem %s549_s23, 256  ;;  %p795_p3 = scmp.lt.s32.totalorder %s549_s23, %s549_s23 }
  0x82   :  { %v181_v8 = vmul.f32 %v179_v59, %v133_v54  ;;  %v153_v9 = vmul.f32 %v151_v60, %v133_v54  ;;  %v205_v13 = vmul.f32 0.125, %v197_v62  ;;  %v230_v16 = vadd.f32 %v229_v3, %v228_v57  ;;  %p791_p2 = scmp.ne.s32.totalorder %s549_s23, %s790_s7  ;;  %p796_p4 = scmp.lt.s32.totalorder %s790_s7, %s790_s7 }
  0x83   :  { %v182_v14 = vmul.f32 %v180_v63, %v133_v54  ;;  %v154_v15 = vmul.f32 %v152_v2, %v133_v54  ;;  %v223_v18 = vadd.f32 %v222_v7, %v221_v58  ;;  %v208_v21 = vmul.f32 %v206_v10, %v133_v54 }
  0x84   :  { %v183_v19 = vsel %vm155_vm1, %v181_v8, 0.0  ;;  %v156_v20 = vsel %vm155_vm1, %v153_v9, 0.0  ;;  %v207_v22 = vmul.f32 %v205_v13, %v133_v54  ;;  %v232_v25 = vmul.f32 0.125, %v230_v16  ;;  %p797_p5 = por %p796_p4, %p795_p3 }
  0x85   :  { %184 = vadd.xlane.f32.xlu1 %v183_v19  ;;  %157 = vadd.xlane.f32.xlu0 %v156_v20  ;;  %v186_v23 = vsel %vm155_vm1, %v182_v14, 0.0  ;;  %v159_v24 = vsel %vm155_vm1, %v154_v15, 0.0  ;;  %v231_v26 = vmul.f32 0.125, %v223_v18  ;;  %v212_v27 = vsel %vm155_vm1, %v208_v21, 0.0 }
  0x86   :  { %v209_v28 = vsel %vm155_vm1, %v207_v22, 0.0  ;;  %v234_v29 = vmul.f32 %v232_v25, %v133_v54  ;;  %v611_v36 = vpack.c.bf16 %v450_v34, %v449_v33  ;;  %v615_v38 = vpack.c.bf16 %v452_v37, %v451_v35  ;;  %p798_p6 = pnand %p797_p5, %p791_p2 }
  0x87   :  { %v233_v30 = vmul.f32 %v231_v26, %v133_v54  ;;  %v162_v39 = vstv %s1129_s4  ;;  %v244_v42 = vstv %s1029_s8  ;;  %v272_v43 = vstv %s1031_s26  ;;  %s1060_s4 = sld [smem:[#allocation9]] }
  0x88   :  { %v238_v31 = vsel %vm155_vm1, %v234_v29, 0.0  ;;  %612 = vmatprep.subr.bf16.mxu0 %v611_v36  ;;  %v252_v45 = vstv %s1033_s27  ;;  %v280_v46 = vstv %s1035_s28  ;;  %v248_v52 = vstv %s1037_s0 }
  0x89   :  { %187 = vadd.xlane.f32.xlu1 %v186_v23  ;;  %160 = vadd.xlane.f32.xlu0 %v159_v24  ;;  %v235_v32 = vsel %vm155_vm1, %v233_v30, 0.0  ;;  %v276_v53 = vstv %s1039_s1  ;;  %v258_v56 = vstv %s1044_s10  ;;  %v286_v57 = vstv %s1046_s11 }
  0x8a   :  { %614 = vmatpush3.bf16.msra.mxu0 %v611_v36  ;;  %v264_v15 = vstv %s1050_s12  ;;  %v292_v16 = vstv %s1052_s13 }
  0x8b   :  { %616 = vmatprep.subr.bf16.mxu0 %v615_v38 }
  0x8d   :  { %213 = vadd.xlane.f32.xlu1 %v212_v27  ;;  %210 = vadd.xlane.f32.xlu0 %v209_v28 }
  0x8e   :  { %618 = vmatpush3.bf16.msra.mxu0 %v615_v38  ;;  %v300_v38 = vstv %s1060_s4 }
  0x91   :  { %239 = vadd.xlane.f32.xlu1 %v238_v31  ;;  %236 = vadd.xlane.f32.xlu0 %v235_v32 }
 0x112   :  { %v185_v40 = vpop.xlane.xlu1 %184  ;;  %v158_v41 = vpop.xlane.xlu0 %157 }
 0x113   :  { %v163_v44 = vadd.f32 %v162_v39, %v158_v41  ;;  %v189_v47 = vadd.f32 %v185_v40, %v162_v39  ;;  %v308_v40 = vstv %s1062_s14  ;;  %v326_v41 = vstv %s1064_s5 }
 0x115   :  { %v245_v48 = vmul.f32 %v244_v42, %v163_v44  ;;  %v273_v49 = vmul.f32 %v272_v43, %v163_v44  ;;  %v253_v62 = vmul.f32 %v252_v45, %v189_v47  ;;  %v281_v63 = vmul.f32 %v280_v46, %v189_v47 }
 0x116   :  { %v188_v50 = vpop.xlane.xlu1 %187  ;;  %v161_v51 = vpop.xlane.xlu0 %160  ;;  %v360_v47 = vstv %s1070_s16 }
 0x117   :  { %v190_v54 = vadd.f32 %v188_v50, %v162_v39  ;;  %v164_v55 = vadd.f32 %v162_v39, %v161_v51  ;;  %v249_v2 = vadd.f32 %v248_v52, %v245_v48  ;;  %v277_v3 = vadd.f32 %v276_v53, %v273_v49 }
 0x118   :  { %v378_v48 = vstv %s1074_s17  ;;  %v386_v49 = vstv %s1076_s18 }
 0x119   :  { %v254_v58 = vmul.f32 %v252_v45, %v190_v54  ;;  %v282_v59 = vmul.f32 %v280_v46, %v190_v54  ;;  %v246_v60 = vmul.f32 %v244_v42, %v164_v55  ;;  %v274_v61 = vmul.f32 %v272_v43, %v164_v55 }
 0x11a   :  { %v214_v7 = vpop.xlane.xlu1 %213  ;;  %v211_v8 = vpop.xlane.xlu0 %210  ;;  %v255_v22 = vadd.f32 %v253_v62, %v249_v2  ;;  %v283_v23 = vadd.f32 %v281_v63, %v277_v3  ;;  %v334_v42 = vstv %s1066_s15  ;;  %v352_v46 = vstv %s1068_s2 }
 0x11b   :  { %v250_v9 = vadd.f32 %v248_v52, %v246_v60  ;;  %v278_v10 = vadd.f32 %v276_v53, %v274_v61  ;;  %v216_v13 = vadd.f32 %v214_v7, %v162_v39  ;;  %v215_v14 = vadd.f32 %v211_v8, %v162_v39 }
 0x11c   :  { %v304_v54 = vstv %s1078_s19  ;;  %v330_v55 = vstv %s1080_s6 }
 0x11d   :  { %v256_v18 = vadd.f32 %v254_v58, %v250_v9  ;;  %v260_v19 = vmul.f32 %v258_v56, %v216_v13  ;;  %v284_v20 = vadd.f32 %v282_v59, %v278_v10  ;;  %v288_v21 = vmul.f32 %v286_v57, %v216_v13 }
 0x11e   :  { %v259_v24 = vmul.f32 %v258_v56, %v215_v14  ;;  %v287_v25 = vmul.f32 %v286_v57, %v215_v14  ;;  %v240_v26 = vpop.xlane.xlu1 %239  ;;  %v237_v27 = vpop.xlane.xlu0 %236  ;;  %v356_v56 = vstv %s1082_s20  ;;  %v382_v57 = vstv %s1084_s21 }
 0x11f   :  { %v242_v28 = vadd.f32 %v240_v26, %v162_v39  ;;  %v241_v29 = vadd.f32 %v237_v27, %v162_v39  ;;  %v262_v30 = vadd.f32 %v260_v19, %v256_v18  ;;  %v290_v31 = vadd.f32 %v288_v21, %v284_v20 }
 0x120   :  { %v261_v32 = vadd.f32 %v259_v24, %v255_v22  ;;  %v289_v33 = vadd.f32 %v287_v25, %v283_v23 }
 0x121   :  { %v266_v34 = vmul.f32 %v264_v15, %v242_v28  ;;  %v294_v35 = vmul.f32 %v292_v16, %v242_v28  ;;  %v265_v36 = vmul.f32 %v264_v15, %v241_v29  ;;  %v293_v37 = vmul.f32 %v292_v16, %v241_v29 }
 0x123   :  { %v268_v39 = vadd.f32 %v266_v34, %v262_v30  ;;  %v296_v43 = vadd.f32 %v294_v35, %v290_v31  ;;  %v267_v44 = vadd.f32 %v265_v36, %v261_v32  ;;  %v295_v45 = vadd.f32 %v293_v37, %v289_v33 }
 0x125   :  { %v270_v50 = vmax.f32 %v268_v39, 0.0  ;;  %v298_v51 = vmax.f32 %v296_v43, 0.0  ;;  %v269_v52 = vmax.f32 %v267_v44, 0.0  ;;  %v297_v53 = vmax.f32 %v295_v45, 0.0 }
 0x127   :  { %v302_v58 = vmul.f32 %v300_v38, %v270_v50  ;;  %v310_v59 = vmul.f32 %v308_v40, %v298_v51  ;;  %v328_v60 = vmul.f32 %v326_v41, %v270_v50  ;;  %v336_v61 = vmul.f32 %v334_v42, %v298_v51 }
 0x128   :  { %v354_v62 = vmul.f32 %v352_v46, %v270_v50  ;;  %v362_v63 = vmul.f32 %v360_v47, %v298_v51  ;;  %v380_v2 = vmul.f32 %v378_v48, %v270_v50  ;;  %v388_v3 = vmul.f32 %v386_v49, %v298_v51 }
 0x129   :  { %v306_v7 = vadd.f32 %v304_v54, %v302_v58  ;;  %v332_v8 = vadd.f32 %v330_v55, %v328_v60  ;;  %v301_v9 = vmul.f32 %v300_v38, %v269_v52  ;;  %v309_v10 = vmul.f32 %v308_v40, %v297_v53 }
 0x12a   :  { %v358_v13 = vadd.f32 %v356_v56, %v354_v62  ;;  %v384_v14 = vadd.f32 %v382_v57, %v380_v2  ;;  %v327_v15 = vmul.f32 %v326_v41, %v269_v52  ;;  %v335_v16 = vmul.f32 %v334_v42, %v297_v53 }
 0x12b   :  { %v312_v18 = vadd.f32 %v310_v59, %v306_v7  ;;  %v338_v19 = vadd.f32 %v336_v61, %v332_v8  ;;  %v305_v20 = vadd.f32 %v304_v54, %v301_v9  ;;  %v353_v21 = vmul.f32 %v352_v46, %v269_v52 }
 0x12c   :  { %v364_v22 = vadd.f32 %v362_v63, %v358_v13  ;;  %v390_v23 = vadd.f32 %v388_v3, %v384_v14  ;;  %v331_v24 = vadd.f32 %v330_v55, %v327_v15  ;;  %v361_v25 = vmul.f32 %v360_v47, %v297_v53 }
 0x12d   :  { %v575_v26 = vmul.f32 -1.442695, %v312_v18  ;;  %v580_v27 = vmul.f32 -1.442695, %v338_v19  ;;  %v311_v28 = vadd.f32 %v309_v10, %v305_v20  ;;  %v357_v29 = vadd.f32 %v356_v56, %v353_v21 }
 0x12e   :  { %v585_v30 = vmul.f32 -1.442695, %v364_v22  ;;  %v590_v31 = vmul.f32 -1.442695, %v390_v23  ;;  %v337_v32 = vadd.f32 %v335_v16, %v331_v24  ;;  %v379_v33 = vmul.f32 %v378_v48, %v269_v52 }
 0x12f   :  { %630 = vpow2.f32 %v575_v26  ;;  %v574_v34 = vmul.f32 -1.442695, %v311_v28  ;;  %v363_v35 = vadd.f32 %v361_v25, %v357_v29  ;;  %v387_v38 = vmul.f32 %v386_v49, %v297_v53 }
 0x130   :  { %632 = vpow2.f32 %v580_v27  ;;  %v579_v36 = vmul.f32 -1.442695, %v337_v32  ;;  %v383_v37 = vadd.f32 %v382_v57, %v379_v33  ;;  %v403_v47 = vlaneseq }
 0x131   :  { %634 = vpow2.f32 %v585_v30  ;;  %v584_v40 = vmul.f32 -1.442695, %v363_v35 }
 0x132   :  { %636 = vpow2.f32 %v590_v31  ;;  %v389_v41 = vadd.f32 %v387_v38, %v383_v37  ;;  %v404_v56 = vshrl.u32 %v403_v47, 7 }
 0x133   :  { %638 = vpow2.f32 %v574_v34 }
 0x134   :  { %640 = vpow2.f32 %v579_v36  ;;  %v589_v42 = vmul.f32 -1.442695, %v389_v41  ;;  %v405_v60 = vsub.s32 0, %v404_v56 }
 0x135   :  { %642 = vpow2.f32 %v584_v40 }
 0x136   :  { %644 = vpow2.f32 %v589_v42 }
 0x139   :  { %v631_v39 = vpop.eup %630 }
 0x13a   :  { %v633_v43 = vpop.eup %632  ;;  %v320_v44 = vadd.f32 1.0, %v631_v39 }
 0x13b   :  { %v635_v45 = vpop.eup %634  ;;  %v346_v46 = vadd.f32 1.0, %v633_v43 }
 0x13c   :  { %v637_v48 = vpop.eup %636  ;;  %646 = vrcp.f32 %v320_v44  ;;  %v372_v50 = vadd.f32 1.0, %v635_v45 }
 0x13d   :  { %v639_v51 = vpop.eup %638  ;;  %648 = vrcp.f32 %v346_v46  ;;  %v398_v49 = vadd.f32 1.0, %v637_v48 }
 0x13e   :  { %v641_v52 = vpop.eup %640  ;;  %650 = vrcp.f32 %v372_v50  ;;  %v319_v53 = vadd.f32 1.0, %v639_v51 }
 0x13f   :  { %v643_v54 = vpop.eup %642  ;;  %652 = vrcp.f32 %v398_v49  ;;  %v345_v55 = vadd.f32 1.0, %v641_v52 }
 0x140   :  { %v645_v57 = vpop.eup %644  ;;  %654 = vrcp.f32 %v319_v53  ;;  %v371_v58 = vadd.f32 1.0, %v643_v54 }
 0x141   :  { %656 = vrcp.f32 %v345_v55  ;;  %v397_v59 = vadd.f32 1.0, %v645_v57 }
 0x142   :  { %658 = vrcp.f32 %v371_v58 }
 0x143   :  { %660 = vrcp.f32 %v397_v59 }
 0x146   :  { %v647_v61 = vpop.eup %646 }
 0x147   :  { %v649_v62 = vpop.eup %648  ;;  %v410_v63 = vrot.slane %v647_v61, %v405_v60 }
 0x148   :  { %v651_v2 = vpop.eup %650  ;;  %v420_v3 = vrot.slane %v649_v62, %v405_v60 }
 0x149   :  { %v653_v7 = vpop.eup %652  ;;  %v412_v8 = vmul.f32 %v410_v63, %v999_v5  ;;  %v432_v9 = vrot.slane %v651_v2, %v405_v60 }
 0x14a   :  { %v655_v10 = vpop.eup %654  ;;  %v422_v13 = vmul.f32 %v420_v3, %v997_v4  ;;  %v444_v24 = vrot.slane %v653_v7, %v405_v60 }
 0x14b   :  { %v657_v14 = vpop.eup %656  ;;  %v406_v15 = vrot.slane %v655_v10, %v405_v60  ;;  %v434_v23 = vmul.f32 %v432_v9, %v1001_v6 }
 0x14c   :  { %v659_v16 = vpop.eup %658  ;;  %v416_v18 = vrot.slane %v657_v14, %v405_v60  ;;  %v424_v19 = vadd.f32 %v422_v13, %v412_v8  ;;  %v446_v4 = vmul.f32 %v444_v24, %v1009_v12 }
 0x14d   :  { %v661_v20 = vpop.eup %660  ;;  %v411_v21 = vmul.f32 %v406_v15, %v991_v1  ;;  %v428_v22 = vrot.slane %v659_v16, %v405_v60  ;;  %v591_v1 = vld [vmem:[#allocation16] ss:$0 sm:$0xff] }
 0x14e   :  { %v421_v25 = vmul.f32 %v416_v18, %v989_v0  ;;  %v440_v26 = vrot.slane %v661_v20, %v405_v60  ;;  %v436_v5 = vadd.f32 %v434_v23, %v424_v19 }
 0x14f   :  { %v433_v28 = vmul.f32 %v428_v22, %v1007_v11 }
 0x150   :  { %v423_v27 = vadd.f32 %v421_v25, %v411_v21  ;;  %v445_v30 = vmul.f32 %v440_v26, %v1015_v17  ;;  %v448_v31 = vadd.f32 %v446_v4, %v436_v5 }
 0x152   :  { %v435_v29 = vadd.f32 %v433_v28, %v423_v27 }
 0x154   :  { %v447_v32 = vadd.f32 %v445_v30, %v435_v29 }
 0x156   :  { %608 = vmatprep.mubr.msk.f32.mxu0 %vm135_vm0, %v447_v32 }
 0x157   :  { %609 = vmatmul.mubr.msk.f32.vlgmr.msra.gmra.mrb[0].mxu0 %vm135_vm0, %v448_v31 }
 0x22a   :  { %v610_v0 = vpop.f32.mrb[0].mxu0 }
 0x22b   :  { %v538_v6 = vadd.f32 %v610_v0, %v591_v1  ;;  %v532_v33 = vpop.f32.mrb[1].mxu0 }
 0x22c   :  { %v533_v34 = vadd.f32 %v591_v1, %v532_v33 }
 0x22d   :  { %542 = vst.msk [vmem:[#allocation18 + $0x8] sm:$0xff] %vm135_vm0, %v538_v6 }
 0x22e   :  { %541 = vst.msk [vmem:[#allocation18] sm:$0xff] %vm135_vm0, %v533_v34 }
 0x22f   :  { %801 = shalt.err (!%p798_p6)
}
 0x230   :  { %s802_s26 = scalar_lea.hbm %s1134_s9, 256 }
 0x231   :  { %p803_p7 = scmp.ne.s32.totalorder %s1134_s9, %s802_s26  ;;  %p806_p8 = scmp.lt.u32.totalorder %s802_s26, %s1134_s9 }
 0x233   :  { %p808_p9 = pnand %p806_p8, %p803_p7 }
 0x235   :  { %811 = shalt.err (!%p808_p9)
}
 0x236   :  { %554 = dma.vmem_to_hbm [thread:$0]  %s549_s23, 256, %s1134_s9, [#allocation5], %s832_s3, %s832_s3, %s833_s24  }
 0x237   :  { %824 = dma.done.wait [#allocation5], 256  }
 0x238   :  { %825 = vsyncadd [#allocation5], 4294967040 }
 0x239   :  { %558 = vsyncpa [#allocation4], 1 }
 0x23a   :  { %559 = vsyncpa [#allocation14], 1 }
 0x23b   :  { %560 = vsyncpa [#allocation17], 1 }
 0x23c   :  { %561 = vsyncpa [#allocation5], 1 }
 0x23d   :  { %562 = vsyncpa [#allocation6], 1 }
 0x23e   :  { %563 = vsyncpa [#allocation8], 1 }
 0x23f   :  { %564 = vsyncpa [#allocation11], 1 }

</bundles_post_ra>
